<compile_context>
chip_gen: v5e
topology: v5e:2x2
jax: 0.10.0
libtpu: 0.0.40
codegen_flags: <defaults>
</compile_context>

<pallas_src>
import jax
import jax.numpy as jnp
from jax.experimental import pallas as pl
from jax.experimental.pallas import tpu as pltpu


def lenet_kernel(x_ref, w1_ref, b1_ref, w2_ref, b2_ref, w3_ref, b3_ref, o_ref):
    # x arrives as the raw f32 HBM stream; cast to bf16 in-kernel (VPU slack).
    x = x_ref[...].astype(jnp.bfloat16)
    # fc1 (bf16 MXU, f32 accumulate) + bias + relu   (dropout1 = identity)
    h1 = jnp.dot(x, w1_ref[...], preferred_element_type=jnp.float32)
    h1 = jnp.maximum(h1 + b1_ref[...], 0.0)
    # fc2 + bias + relu   (dropout2 = identity)
    h2 = jnp.dot(h1.astype(jnp.bfloat16), w2_ref[...],
                 preferred_element_type=jnp.float32)
    h2 = jnp.maximum(h2 + b2_ref[...], 0.0)
    # fc3 logits, stored as a narrow (TB, num_classes) f32 tile
    out = jnp.dot(h2.astype(jnp.bfloat16), w3_ref[...],
                  preferred_element_type=jnp.float32)
    o_ref[...] = (out + b3_ref[...]).astype(o_ref.dtype)


def _round_up(n, m):
    return ((n + m - 1) // m) * m


def lenet_forward(x, params, revision=False, tile_b=1024):
    """x: [B, C, H, W] with C*H*W == 784.  Returns logits [B, num_classes]
    (or (logits, correction) if revision=True, matching the PyTorch module)."""
    w1t, b1, w2t, b2, w3t, b3, t_rev = params
    B = x.shape[0]
    K = w1t.shape[0]            # 784
    H = w1t.shape[1]            # 128
    num_classes = w3t.shape[1]

    # ---- host-side prep: flatten x (no pad/cast of the dominant stream) ----
    x2d = x.reshape(B, -1).astype(jnp.float32)
    assert x2d.shape[1] == K

    # Batch only needs to be a multiple of 8 (sublane). Typical batches already
    # are; only tiny/odd batches pay a (tiny) pad copy (e.g. the B=2 demo).
    B8 = _round_up(max(B, 1), 8)
    if B8 != B:
        x2d = jnp.pad(x2d, ((0, B8 - B), (0, 0)))

    # Adaptive batch tile: as large as possible (amortize ~0.35us/step pipeline
    # overhead) but split into >= 2 grid tiles when there is enough work so the
    # "parallel" axis can shard across both v7x TensorCores.
    TB = min(tile_b, B8)
    if TB == B8 and B8 >= 16:
        TB = _round_up(B8 // 2, 8)
    TB = _round_up(TB, 8)
    n_tiles = pl.cdiv(B8, TB)
    # NB: a partial last x tile reads out-of-bounds rows (unspecified values);
    # this is safe because rows are independent and the corresponding output
    # rows are masked on writeback / sliced away.

    # Small resident operands: weights in bf16, biases in f32.
    w1_p = w1t.astype(jnp.bfloat16)                      # [784, 128]
    w2_p = w2t.astype(jnp.bfloat16)                      # [128, 128]
    w3_p = w3t.astype(jnp.bfloat16)                      # [128, num_classes]
    b1_p = b1.astype(jnp.float32).reshape(1, H)
    b2_p = b2.astype(jnp.float32).reshape(1, H)
    b3_p = b3.astype(jnp.float32).reshape(1, num_classes)

    cost = pl.CostEstimate(
        flops=2 * B8 * (K * H + H * H + H * num_classes),
        transcendentals=0,
        bytes_accessed=(B8 * K * 4                              # x stream (f32)
                        + (K * H + H * H + H * num_classes) * 2  # weights (bf16)
                        + (2 * H + num_classes) * 4              # biases (f32)
                        + B8 * num_classes * 4),                 # logits (f32)
    )

    out_full = pl.pallas_call(
        lenet_kernel,
        out_shape=jax.ShapeDtypeStruct((B8, num_classes), jnp.float32),
        grid=(n_tiles,),
        in_specs=[
            pl.BlockSpec((TB, K), lambda i: (i, 0)),            # x tile (pipelined)
            pl.BlockSpec((K, H), lambda i: (0, 0)),             # w1 (resident)
            pl.BlockSpec((1, H), lambda i: (0, 0)),             # b1
            pl.BlockSpec((H, H), lambda i: (0, 0)),             # w2
            pl.BlockSpec((1, H), lambda i: (0, 0)),             # b2
            pl.BlockSpec((H, num_classes), lambda i: (0, 0)),   # w3 (narrow)
            pl.BlockSpec((1, num_classes), lambda i: (0, 0)),   # b3 (narrow)
        ],
        out_specs=pl.BlockSpec((TB, num_classes), lambda i: (i, 0)),
        compiler_params=pltpu.CompilerParams(
            dimension_semantics=("parallel",),
            vmem_limit_bytes=32 << 20,
        ),
        cost_estimate=cost,
    )(x2d, w1_p, b1_p, w2_p, b2_p, w3_p, b3_p)

    logits = out_full[:B]
    if revision:
        return logits, t_rev
    return logits


def init_params(key, num_classes=10):
    """Deterministic parameter init mimicking nn.Linear default (uniform in
    [-1/sqrt(fan_in), 1/sqrt(fan_in)]).  Weights stored as [in, out]."""
    def linear(k, fan_in, fan_out, bias=True):
        kw, kb = jax.random.split(k)
        bound = 1.0 / jnp.sqrt(fan_in)
        w_t = jax.random.uniform(kw, (fan_in, fan_out), jnp.float32, -bound, bound)
        if bias:
            b = jax.random.uniform(kb, (1, fan_out), jnp.float32, -bound, bound)
            return w_t, b
        return w_t

    k1, k2, k3, k4 = jax.random.split(key, 4)
    w1t, b1 = linear(k1, 784, 128)
    w2t, b2 = linear(k2, 128, 128)
    w3t, b3 = linear(k3, 128, num_classes)
    t_rev = linear(k4, num_classes, num_classes, bias=False)  # T_revision.weight (no bias)
    return (w1t, b1, w2t, b2, w3t, b3, t_rev)


def lenet_ref(x, params):
    """Plain-JAX reference using the same bf16-input / f32-accumulate recipe."""
    w1t, b1, w2t, b2, w3t, b3, _ = params
    h = x.reshape(x.shape[0], -1).astype(jnp.bfloat16)
    h = jnp.maximum(
        jnp.dot(h, w1t.astype(jnp.bfloat16), preferred_element_type=jnp.float32) + b1, 0.0)
    h = jnp.maximum(
        jnp.dot(h.astype(jnp.bfloat16), w2t.astype(jnp.bfloat16),
                preferred_element_type=jnp.float32) + b2, 0.0)
    return jnp.dot(h.astype(jnp.bfloat16), w3t.astype(jnp.bfloat16),
                   preferred_element_type=jnp.float32) + b3


if __name__ == "__main__":
    key = jax.random.PRNGKey(0)
    k_params, k_x = jax.random.split(key)

    num_classes = 10
    params = init_params(k_params, num_classes=num_classes)

    # Small deterministic input consistent with forward's view(B, 784):
    # NCHW [batch=2, channels=1, 28, 28].
    x = jax.random.normal(k_x, (2, 1, 28, 28), dtype=jnp.float32)

    logits = lenet_forward(x, params)
    logits = jax.block_until_ready(logits)

    ref = lenet_ref(x, params)
    assert logits.shape == (2, num_classes)
    assert jnp.allclose(logits, ref, atol=2e-2, rtol=2e-2), "mismatch vs reference"

    # revision=True path returns (logits, T_revision.weight)
    logits_r, correction = lenet_forward(x, params, revision=True)
    jax.block_until_ready(logits_r)
    assert correction.shape == (num_classes, num_classes)

    print("KERNEL_OK")
</pallas_src>

<mosaic_0001>
module attributes {stable_mosaic.version = 11 : i64} {
  func.func @lenet_kernel(%arg0: i32, %arg1: memref<8x784xf32, #tpu.memory_space<vmem>>, %arg2: memref<784x128xbf16, #tpu.memory_space<vmem>>, %arg3: memref<1x128xf32, #tpu.memory_space<vmem>>, %arg4: memref<128x128xbf16, #tpu.memory_space<vmem>>, %arg5: memref<1x128xf32, #tpu.memory_space<vmem>>, %arg6: memref<128x10xbf16, #tpu.memory_space<vmem>>, %arg7: memref<1x10xf32, #tpu.memory_space<vmem>>, %arg8: memref<8x10xf32, #tpu.memory_space<vmem>>) attributes {dimension_semantics = [#tpu.dimension_semantics<parallel>], iteration_bounds = array<i64: 1>, scalar_prefetch = 0 : i64, scratch_operands = 0 : i64, tpu.core_type = #tpu.core_type<tc>, window_params = [{transform_indices = @transform_0, window_bounds = array<i64: 8, 784>}, {pipeline_mode = #tpu.pipeline_mode<synchronous>, transform_indices = @transform_1, window_bounds = array<i64: 784, 128>}, {pipeline_mode = #tpu.pipeline_mode<synchronous>, transform_indices = @transform_2, window_bounds = array<i64: 1, 128>}, {pipeline_mode = #tpu.pipeline_mode<synchronous>, transform_indices = @transform_3, window_bounds = array<i64: 128, 128>}, {pipeline_mode = #tpu.pipeline_mode<synchronous>, transform_indices = @transform_4, window_bounds = array<i64: 1, 128>}, {pipeline_mode = #tpu.pipeline_mode<synchronous>, transform_indices = @transform_5, window_bounds = array<i64: 128, 10>}, {pipeline_mode = #tpu.pipeline_mode<synchronous>, transform_indices = @transform_6, window_bounds = array<i64: 1, 10>}, {transform_indices = @transform_7, window_bounds = array<i64: 8, 10>}]} {
    %c0 = arith.constant 0 : index
    %c0_0 = arith.constant 0 : index
    %0 = vector.load %arg1[%c0, %c0_0] : memref<8x784xf32, #tpu.memory_space<vmem>>, vector<8x784xf32>
    %1 = arith.truncf %0 : vector<8x784xf32> to vector<8x784xbf16>
    %c0_1 = arith.constant 0 : index
    %c0_2 = arith.constant 0 : index
    %2 = vector.load %arg2[%c0_1, %c0_2] : memref<784x128xbf16, #tpu.memory_space<vmem>>, vector<784x128xbf16>
    %cst = arith.constant dense<0.000000e+00> : vector<8x128xf32>
    %3 = tpu.matmul %1, %2, %cst {dimension_numbers = #tpu.dot_dimension_numbers<[1], [0], [0], [1], [0, 0, 1, 1], [], []>} : vector<8x784xbf16>, vector<784x128xbf16>, vector<8x128xf32> -> vector<8x128xf32>
    %c0_3 = arith.constant 0 : index
    %c0_4 = arith.constant 0 : index
    %4 = vector.load %arg3[%c0_3, %c0_4] : memref<1x128xf32, #tpu.memory_space<vmem>>, vector<1x128xf32>
    %5 = vector.broadcast %4 : vector<1x128xf32> to vector<8x128xf32>
    %6 = arith.addf %3, %5 : vector<8x128xf32>
    %cst_5 = arith.constant 0.000000e+00 : f32
    %7 = vector.broadcast %cst_5 : f32 to vector<8x128xf32>
    %8 = arith.maximumf %6, %7 : vector<8x128xf32>
    %9 = arith.truncf %8 : vector<8x128xf32> to vector<8x128xbf16>
    %c0_6 = arith.constant 0 : index
    %c0_7 = arith.constant 0 : index
    %10 = vector.load %arg4[%c0_6, %c0_7] : memref<128x128xbf16, #tpu.memory_space<vmem>>, vector<128x128xbf16>
    %cst_8 = arith.constant dense<0.000000e+00> : vector<8x128xf32>
    %11 = tpu.matmul %9, %10, %cst_8 {dimension_numbers = #tpu.dot_dimension_numbers<[1], [0], [0], [1], [0, 0, 1, 1], [], []>} : vector<8x128xbf16>, vector<128x128xbf16>, vector<8x128xf32> -> vector<8x128xf32>
    %c0_9 = arith.constant 0 : index
    %c0_10 = arith.constant 0 : index
    %12 = vector.load %arg5[%c0_9, %c0_10] : memref<1x128xf32, #tpu.memory_space<vmem>>, vector<1x128xf32>
    %13 = vector.broadcast %12 : vector<1x128xf32> to vector<8x128xf32>
    %14 = arith.addf %11, %13 : vector<8x128xf32>
    %cst_11 = arith.constant 0.000000e+00 : f32
    %15 = vector.broadcast %cst_11 : f32 to vector<8x128xf32>
    %16 = arith.maximumf %14, %15 : vector<8x128xf32>
    %17 = arith.truncf %16 : vector<8x128xf32> to vector<8x128xbf16>
    %c0_12 = arith.constant 0 : index
    %c0_13 = arith.constant 0 : index
    %18 = vector.load %arg6[%c0_12, %c0_13] : memref<128x10xbf16, #tpu.memory_space<vmem>>, vector<128x10xbf16>
    %cst_14 = arith.constant dense<0.000000e+00> : vector<8x10xf32>
    %19 = tpu.matmul %17, %18, %cst_14 {dimension_numbers = #tpu.dot_dimension_numbers<[1], [0], [0], [1], [0, 0, 1, 1], [], []>} : vector<8x128xbf16>, vector<128x10xbf16>, vector<8x10xf32> -> vector<8x10xf32>
    %c0_15 = arith.constant 0 : index
    %c0_16 = arith.constant 0 : index
    %20 = vector.load %arg7[%c0_15, %c0_16] : memref<1x10xf32, #tpu.memory_space<vmem>>, vector<1x10xf32>
    %21 = vector.broadcast %20 : vector<1x10xf32> to vector<8x10xf32>
    %22 = arith.addf %19, %21 : vector<8x10xf32>
    %c0_17 = arith.constant 0 : index
    %c0_18 = arith.constant 0 : index
    %23 = vector.load %arg8[%c0_17, %c0_18] : memref<8x10xf32, #tpu.memory_space<vmem>>, vector<8x10xf32>
    tpu.vector_store %arg8[%c0_17, %c0_18], %22 {strides = array<i32>} : memref<8x10xf32, #tpu.memory_space<vmem>>, vector<8x10xf32>,
    return
  }
  func.func @transform_0(%arg0: i32) -> (i32, i32) {
    %c0_i32 = arith.constant 0 : i32
    %c0_i32_0 = arith.constant 0 : i32
    return %arg0, %c0_i32 : i32, i32
  }
  func.func @transform_1(%arg0: i32) -> (i32, i32) {
    %c0_i32 = arith.constant 0 : i32
    %c0_i32_0 = arith.constant 0 : i32
    %c0_i32_1 = arith.constant 0 : i32
    return %c0_i32, %c0_i32_0 : i32, i32
  }
  func.func @transform_2(%arg0: i32) -> (i32, i32) {
    %c0_i32 = arith.constant 0 : i32
    %c0_i32_0 = arith.constant 0 : i32
    %c0_i32_1 = arith.constant 0 : i32
    return %c0_i32, %c0_i32_0 : i32, i32
  }
  func.func @transform_3(%arg0: i32) -> (i32, i32) {
    %c0_i32 = arith.constant 0 : i32
    %c0_i32_0 = arith.constant 0 : i32
    %c0_i32_1 = arith.constant 0 : i32
    return %c0_i32, %c0_i32_0 : i32, i32
  }
  func.func @transform_4(%arg0: i32) -> (i32, i32) {
    %c0_i32 = arith.constant 0 : i32
    %c0_i32_0 = arith.constant 0 : i32
    %c0_i32_1 = arith.constant 0 : i32
    return %c0_i32, %c0_i32_0 : i32, i32
  }
  func.func @transform_5(%arg0: i32) -> (i32, i32) {
    %c0_i32 = arith.constant 0 : i32
    %c0_i32_0 = arith.constant 0 : i32
    %c0_i32_1 = arith.constant 0 : i32
    return %c0_i32, %c0_i32_0 : i32, i32
  }
  func.func @transform_6(%arg0: i32) -> (i32, i32) {
    %c0_i32 = arith.constant 0 : i32
    %c0_i32_0 = arith.constant 0 : i32
    %c0_i32_1 = arith.constant 0 : i32
    return %c0_i32, %c0_i32_0 : i32, i32
  }
  func.func @transform_7(%arg0: i32) -> (i32, i32) {
    %c0_i32 = arith.constant 0 : i32
    %c0_i32_0 = arith.constant 0 : i32
    return %arg0, %c0_i32 : i32, i32
  }
}

</mosaic_0001>

<bundles_post_ra>
// kernel: tpu_custom_call.1
= control target key start
LH: loop header
LB: loop body
LE: loop exit
PB: predicated region body
PF: predicated region fallthrough
CT: control target
= control target key end

     0   :  { %12 = vsyncpa [#allocation3], 0  ;;  %s1272_s0 = inlined_call_operand.hbm [shape: f32[8,784], index: 0, kind: input, shape index: {}]   ;;  %s1273_s1 = inlined_call_operand.hbm [shape: bf16[784,128], index: 1, kind: input, shape index: {}]   ;;  %s1274_s2 = inlined_call_operand.vmem [shape: f32[1,128], index: 2, kind: input, shape index: {}]   ;;  %s1275_s3 = inlined_call_operand.vmem [shape: bf16[128,128], index: 3, kind: input, shape index: {}]   ;;  %s1276_s4 = inlined_call_operand.vmem [shape: f32[1,128], index: 4, kind: input, shape index: {}]   ;;  %s1277_s5 = inlined_call_operand.vmem [shape: bf16[128,10], index: 5, kind: input, shape index: {}]   ;;  %s1278_s6 = inlined_call_operand.vmem [shape: f32[1,10], index: 6, kind: input, shape index: {}]   ;;  %s1279_s7 = inlined_call_operand.hbm [shape: f32[8,10], index: 7, kind: output, shape index: {}]  }
   0x1   :  { %13 = vsyncpa [#allocation6], 0 }
   0x2   :  { %14 = vsyncpa [#allocation4], 0  ;;  %s20_s26 = sshll.u32 %s1272_s0, 4  ;;  %s1161_s27 = smov [#allocation2]   ;;  %s21_s26 = int_to_ptr.hbm [resolvable:$true] %s20_s26 }
   0x3   :  { %s22_s28 = sshll.u32 %s1161_s27, 4  ;;  %s30_s8 = sshll.u32 %s1273_s1, 4  ;;  %s23_s28 = int_to_ptr.vmem [resolvable:$true] %s22_s28  ;;  %s31_s8 = int_to_ptr.hbm [resolvable:$true] %s30_s8 }
   0x4   :  { %25 = dma.hbm_to_vmem [thread:$0]  %s21_s26, 896, %s23_s28, [#allocation3]  }
   0x5   :  { %s1162_s9 = smov [#allocation5]   ;;  %s1163_s11 = smov 64  }
   0x6   :  { %s32_s10 = sshll.u32 %s1162_s9, 4  ;;  %s1164_s12 = smov 4   ;;  %s33_s10 = int_to_ptr.vmem [resolvable:$true] %s32_s10 }
   0x7   :  { %38 = dma.hbm_to_vmem [thread:$0]  %s31_s8, 6272, %s33_s10, [#allocation6], %s1163_s11, %s1163_s11, %s1164_s12  }
   0x8   :  { %1155 = dma.done.wait [#allocation3], 896  }
   0x9   :  { %1156 = vsyncadd [#allocation3], 4294966400 }
   0xa   :  { %1157 = dma.done.wait [#allocation6], 6272  }
   0xb   :  { %1158 = vsyncadd [#allocation6], 4294961024  ;;  %v1017_v0 = vld [vmem:[#allocation5 + $0x38] sm:$0xff]  ;;  %v1016_v3 = vld [vmem:[#allocation5 + $0x30] sm:$0xff]  ;;  %vm468_vm0 = vcmask 130048   ;;  %s1165_s22 = smov [#allocation7]  }
   0xc   :  { %v1025_v1 = vld [vmem:[#allocation5 + $0x78] sm:$0xff]  ;;  %472 = vmatpush.bf16.msra.mxu0 %v1017_v0  ;;  %v1024_v4 = vld [vmem:[#allocation5 + $0x70] sm:$0xff]  ;;  %v1015_v8 = vld [vmem:[#allocation5 + $0x28] sm:$0xff]  ;;  %s736_s23 = sshll.u32 %s1165_s22, 4  ;;  %vm729_vm1 = vcmask 80896   ;;  %s737_s23 = int_to_ptr.vmem [resolvable:$true] %s736_s23 }
   0xd   :  { %v1033_v2 = vld [vmem:[#allocation5 + $0xb8] sm:$0xff]  ;;  %485 = vmatpush.bf16.msra.mxu1 %v1025_v1  ;;  %v1032_v5 = vld [vmem:[#allocation5 + $0xb0] sm:$0xff]  ;;  %v1023_v9 = vld [vmem:[#allocation5 + $0x68] sm:$0xff] }
   0xe   :  { %498 = vmatpush.bf16.msra.mxu2 %v1033_v2  ;;  %v1041_v6 = vld [vmem:[#allocation5 + $0xf8] sm:$0xff]  ;;  %v1040_v7 = vld [vmem:[#allocation5 + $0xf0] sm:$0xff]  ;;  %v1031_v10 = vld [vmem:[#allocation5 + $0xa8] sm:$0xff] }
   0xf   :  { %511 = vmatpush.bf16.msra.mxu3 %v1041_v6  ;;  %v1039_v11 = vld [vmem:[#allocation5 + $0xe8] sm:$0xff]  ;;  %v1014_v12 = vld [vmem:[#allocation5 + $0x20] sm:$0xff]  ;;  %v1013_v16 = vld [vmem:[#allocation5 + $0x18] sm:$0xff] }
  0x10   :  { %473 = vmatpush.bf16.msra.mxu0 %v1016_v3  ;;  %v1022_v13 = vld [vmem:[#allocation5 + $0x60] sm:$0xff]  ;;  %v1021_v17 = vld [vmem:[#allocation5 + $0x58] sm:$0xff]  ;;  %v1012_v20 = vld [vmem:[#allocation5 + $0x10] sm:$0xff] }
  0x11   :  { %486 = vmatpush.bf16.msra.mxu1 %v1024_v4  ;;  %v1030_v14 = vld [vmem:[#allocation5 + $0xa0] sm:$0xff]  ;;  %v1029_v18 = vld [vmem:[#allocation5 + $0x98] sm:$0xff]  ;;  %v1020_v21 = vld [vmem:[#allocation5 + $0x50] sm:$0xff] }
  0x12   :  { %499 = vmatpush.bf16.msra.mxu2 %v1032_v5  ;;  %v1038_v15 = vld [vmem:[#allocation5 + $0xe0] sm:$0xff]  ;;  %v1037_v19 = vld [vmem:[#allocation5 + $0xd8] sm:$0xff]  ;;  %v1028_v22 = vld [vmem:[#allocation5 + $0x90] sm:$0xff] }
  0x13   :  { %512 = vmatpush.bf16.msra.mxu3 %v1040_v7  ;;  %v1036_v23 = vld [vmem:[#allocation5 + $0xd0] sm:$0xff]  ;;  %v1011_v24 = vld [vmem:[#allocation5 + $0x8] sm:$0xff]  ;;  %v1010_v27 = vld [vmem:[#allocation5] sm:$0xff] }
  0x14   :  { %474 = vmatpush.bf16.msra.mxu0 %v1015_v8  ;;  %v1019_v25 = vld [vmem:[#allocation5 + $0x48] sm:$0xff]  ;;  %v1018_v29 = vld [vmem:[#allocation5 + $0x40] sm:$0xff]  ;;  %v59_v31 = vld [vmem:[#allocation2 + $0x8] sm:$0xff] }
  0x15   :  { %487 = vmatpush.bf16.msra.mxu1 %v1023_v9  ;;  %v1027_v26 = vld [vmem:[#allocation5 + $0x88] sm:$0xff]  ;;  %v1049_v32 = vld [vmem:[#allocation5 + $0x138] sm:$0xff]  ;;  %v1026_v34 = vld [vmem:[#allocation5 + $0x80] sm:$0xff]  ;;  %v66_v37 = vpack.c.bf16 %v59_v31, %v59_v31 }
  0x16   :  { %500 = vmatpush.bf16.msra.mxu2 %v1031_v10  ;;  %v1035_v28 = vld [vmem:[#allocation5 + $0xc8] sm:$0xff]  ;;  %v1057_v33 = vld [vmem:[#allocation5 + $0x178] sm:$0xff]  ;;  %v1034_v38 = vld [vmem:[#allocation5 + $0xc0] sm:$0xff] }
  0x17   :  { %513 = vmatpush.bf16.msra.mxu3 %v1039_v11  ;;  %v58_v30 = vld [vmem:[#allocation2] sm:$0xff]  ;;  %v60_v35 = vld [vmem:[#allocation2 + $0x10] sm:$0xff]  ;;  %v1058_v39 = vld [vmem:[#allocation5 + $0x180] sm:$0xff] }
  0x18   :  { %475 = vmatpush.bf16.msra.mxu0 %v1014_v12  ;;  %v65_v36 = vpack.c.bf16 %v58_v30, %v58_v30  ;;  %v61_v40 = vld [vmem:[#allocation2 + $0x18] sm:$0xff]  ;;  %v1048_v41 = vld [vmem:[#allocation5 + $0x130] sm:$0xff]  ;;  %v67_v43 = vpack.c.bf16 %v60_v35, %v60_v35  ;;  %v1047_v45 = vld [vmem:[#allocation5 + $0x128] sm:$0xff] }
  0x19   :  { %488 = vmatpush.bf16.msra.mxu1 %v1022_v13  ;;  %v1056_v42 = vld [vmem:[#allocation5 + $0x170] sm:$0xff]  ;;  %v68_v44 = vpack.c.bf16 %v61_v40, %v61_v40  ;;  %v1055_v46 = vld [vmem:[#allocation5 + $0x168] sm:$0xff]  ;;  %v1046_v47 = vld [vmem:[#allocation5 + $0x120] sm:$0xff] }
  0x1a   :  { %501 = vmatpush.bf16.msra.mxu2 %v1030_v14  ;;  %v1054_v48 = vld [vmem:[#allocation5 + $0x160] sm:$0xff]  ;;  %v1045_v49 = vld [vmem:[#allocation5 + $0x118] sm:$0xff]  ;;  %v1044_v52 = vld [vmem:[#allocation5 + $0x110] sm:$0xff] }
  0x1b   :  { %514 = vmatpush.bf16.msra.mxu3 %v1038_v15  ;;  %v1053_v50 = vld [vmem:[#allocation5 + $0x158] sm:$0xff]  ;;  %v1052_v53 = vld [vmem:[#allocation5 + $0x150] sm:$0xff]  ;;  %v1043_v55 = vld [vmem:[#allocation5 + $0x108] sm:$0xff] }
  0x1c   :  { %476 = vmatpush.bf16.msra.mxu0 %v1013_v16  ;;  %v64_v51 = vld [vmem:[#allocation2 + $0x30] sm:$0xff]  ;;  %v1051_v56 = vld [vmem:[#allocation5 + $0x148] sm:$0xff]  ;;  %v1042_v57 = vld [vmem:[#allocation5 + $0x100] sm:$0xff] }
  0x1d   :  { %489 = vmatpush.bf16.msra.mxu1 %v1021_v17  ;;  %v71_v54 = vpack.c.bf16 %v64_v51, %v64_v51  ;;  %v1050_v58 = vld [vmem:[#allocation5 + $0x140] sm:$0xff]  ;;  %v62_v59 = vld [vmem:[#allocation2 + $0x20] sm:$0xff]  ;;  %v63_v60 = vld [vmem:[#allocation2 + $0x28] sm:$0xff] }
  0x1e   :  { %502 = vmatpush.bf16.msra.mxu2 %v1029_v18  ;;  %v69_v61 = vpack.c.bf16 %v62_v59, %v62_v59  ;;  %v70_v62 = vpack.c.bf16 %v63_v60, %v63_v60  ;;  %v1066_v63 = vld [vmem:[%s1275_s3 + $0x38] sm:$0xff]  ;;  %v1065_v0 = vld [vmem:[%s1275_s3 + $0x30] sm:$0xff]  ;;  %v1064_v1 = vld [vmem:[%s1275_s3 + $0x28] sm:$0xff] }
  0x1f   :  { %515 = vmatpush.bf16.msra.mxu3 %v1037_v19  ;;  %v1063_v2 = vld [vmem:[%s1275_s3 + $0x20] sm:$0xff]  ;;  %v1062_v3 = vld [vmem:[%s1275_s3 + $0x18] sm:$0xff]  ;;  %v1061_v4 = vld [vmem:[%s1275_s3 + $0x10] sm:$0xff] }
  0x20   :  { %477 = vmatpush.bf16.msra.mxu0 %v1012_v20  ;;  %v1060_v5 = vld [vmem:[%s1275_s3 + $0x8] sm:$0xff]  ;;  %v1059_v8 = vld [vmem:[%s1275_s3] sm:$0xff]  ;;  %v1074_v11 = vld [vmem:[%s1277_s5 + $0x38] sm:$0xff] }
  0x21   :  { %490 = vmatpush.bf16.msra.mxu1 %v1020_v21  ;;  %v1073_v14 = vld [vmem:[%s1277_s5 + $0x30] sm:$0xff]  ;;  %v1080_v15 = vld [vmem:[%s1274_s2] ss:$0 sm:$0xff]  ;;  %v1072_v16 = vld [vmem:[%s1277_s5 + $0x28] sm:$0xff] }
  0x22   :  { %503 = vmatpush.bf16.msra.mxu2 %v1028_v22  ;;  %v1071_v20 = vld [vmem:[%s1277_s5 + $0x20] sm:$0xff]  ;;  %v1070_v22 = vld [vmem:[%s1277_s5 + $0x18] sm:$0xff] }
  0x23   :  { %516 = vmatpush.bf16.msra.mxu3 %v1036_v23 }
  0x24   :  { %478 = vmatpush.bf16.msra.mxu0 %v1011_v24 }
  0x25   :  { %491 = vmatpush.bf16.msra.mxu1 %v1019_v25  ;;  %v1069_v25 = vld [vmem:[%s1277_s5 + $0x10] sm:$0xff] }
  0x26   :  { %504 = vmatpush.bf16.msra.mxu2 %v1027_v26 }
  0x27   :  { %517 = vmatpush.bf16.msra.mxu3 %v1035_v28 }
  0x28   :  { %479 = vmatpush.bf16.msra.mxu0 %v1010_v27 }
  0x29   :  { %492 = vmatpush.bf16.msra.mxu1 %v1018_v29 }
  0x2a   :  { %505 = vmatpush.bf16.msra.mxu2 %v1026_v34 }
  0x2b   :  { %480 = vmatmul.bf16.vlgmr.msra.gmra.mxu0 %v65_v36  ;;  %518 = vmatpush.bf16.msra.mxu3 %v1034_v38  ;;  %v1067_v38 = vld [vmem:[%s1277_s5] sm:$0xff] }
  0x2c   :  { %524 = vmatpush.bf16.msrb.mxu0 %v1049_v32  ;;  %493 = vmatmul.bf16.vlgmr.msra.gmra.mxu1 %v66_v37  ;;  %v1068_v37 = vld [vmem:[%s1277_s5 + $0x8] sm:$0xff]  ;;  %s738_s5 = sshll.u32 %s1279_s7, 4  ;;  %s739_s5 = int_to_ptr.hbm [resolvable:$true] %s738_s5 }
  0x2d   :  { %537 = vmatpush.bf16.msrb.mxu1 %v1057_v33  ;;  %506 = vmatmul.bf16.vlgmr.msra.gmra.mxu2 %v67_v43 }
  0x2e   :  { %557 = vmatpush.bf16.msrb.mxu2 %v1058_v39  ;;  %519 = vmatmul.bf16.vlgmr.msra.gmra.mxu3 %v68_v44  ;;  %v1081_v39 = vld [vmem:[%s1276_s4] ss:$0 sm:$0xff] }
  0x2f   :  { %633 = vmatpush.bf16.msrb.mxu3 %v1066_v63 }
  0x30   :  { %525 = vmatpush.bf16.msrb.mxu0 %v1048_v41 }
  0x31   :  { %538 = vmatpush.bf16.msrb.mxu1 %v1056_v42 }
  0x32   :  { %716 = vmatpush.bf16.msra.mxu2 %v1074_v11 }
  0x33   :  { %634 = vmatpush.bf16.msrb.mxu3 %v1065_v0 }
  0x34   :  { %526 = vmatpush.bf16.msrb.mxu0 %v1047_v45  ;;  %v1082_v45 = vld [vmem:[%s1278_s6] ss:$0 sm:$0xff] }
  0x35   :  { %539 = vmatpush.bf16.msrb.mxu1 %v1055_v46 }
  0x36   :  { %717 = vmatpush.bf16.msra.mxu2 %v1073_v14 }
  0x37   :  { %635 = vmatpush.bf16.msrb.mxu3 %v1064_v1 }
  0x38   :  { %527 = vmatpush.bf16.msrb.mxu0 %v1046_v47 }
  0x39   :  { %540 = vmatpush.bf16.msrb.mxu1 %v1054_v48 }
  0x3a   :  { %718 = vmatpush.bf16.msra.mxu2 %v1072_v16 }
  0x3b   :  { %636 = vmatpush.bf16.msrb.mxu3 %v1063_v2 }
  0x3c   :  { %528 = vmatpush.bf16.msrb.mxu0 %v1045_v49 }
  0x3d   :  { %541 = vmatpush.bf16.msrb.mxu1 %v1053_v50  ;;  %945 = vmatmul.msk.bf16.vlgmr.msrb.gmra.mxu2 %vm468_vm0, %v71_v54 }
  0x3e   :  { %719 = vmatpush.bf16.msra.mxu2 %v1071_v20 }
  0x3f   :  { %637 = vmatpush.bf16.msrb.mxu3 %v1062_v3 }
  0x40   :  { %529 = vmatpush.bf16.msrb.mxu0 %v1044_v52 }
  0x41   :  { %542 = vmatpush.bf16.msrb.mxu1 %v1052_v53 }
  0x42   :  { %720 = vmatpush.bf16.msra.mxu2 %v1070_v22 }
  0x43   :  { %638 = vmatpush.bf16.msrb.mxu3 %v1061_v4 }
  0x44   :  { %530 = vmatpush.bf16.msrb.mxu0 %v1043_v55 }
  0x45   :  { %543 = vmatpush.bf16.msrb.mxu1 %v1051_v56 }
  0x46   :  { %721 = vmatpush.bf16.msra.mxu2 %v1069_v25 }
  0x47   :  { %639 = vmatpush.bf16.msrb.mxu3 %v1060_v5 }
  0x48   :  { %531 = vmatpush.bf16.msrb.mxu0 %v1042_v57 }
  0x49   :  { %544 = vmatpush.bf16.msrb.mxu1 %v1050_v58 }
  0x4a   :  { %722 = vmatpush.bf16.msra.mxu2 %v1068_v37 }
  0x4b   :  { %532 = vmatmul.bf16.vlgmr.msrb.gmra.mxu0 %v69_v61  ;;  %640 = vmatpush.bf16.msrb.mxu3 %v1059_v8 }
  0x4c   :  { %545 = vmatmul.bf16.vlgmr.msrb.gmra.mxu1 %v70_v62 }
  0x4e   :  { %723 = vmatpush.bf16.msra.mxu2 %v1067_v38 }
  0xa8   :  { %v481_v6 = vpop.f32.mrf.mxu0 }
  0xa9   :  { %v494_v7 = vpop.f32.mrf.mxu1  ;;  %v482_v17 = vadd.f32 %v1080_v15, %v481_v6 }
  0xab   :  { %v495_v21 = vadd.f32 %v494_v7, %v482_v17 }
  0xb0   :  { %v483_v9 = vpop.f32.mrf.mxu0  ;;  %v507_v12 = vpop.f32.mrf.mxu2 }
  0xb1   :  { %v496_v10 = vpop.f32.mrf.mxu1  ;;  %v520_v13 = vpop.f32.mrf.mxu3  ;;  %v508_v23 = vadd.f32 %v507_v12, %v495_v21 }
  0xb3   :  { %v521_v26 = vadd.f32 %v520_v13, %v508_v23 }
  0xb8   :  { %v509_v18 = vpop.f32.mrf.mxu2 }
  0xb9   :  { %v522_v19 = vpop.f32.mrf.mxu3 }
  0xc0   :  { %v559_v24 = vpop.f32.mrf.mxu2 }
  0xc8   :  { %v533_v27 = vpop.f32.mrf.mxu0  ;;  %v561_v31 = vpop.f32.mrf.mxu2 }
  0xc9   :  { %v546_v28 = vpop.f32.mrf.mxu1  ;;  %v534_v29 = vadd.f32 %v533_v27, %v521_v26 }
  0xcb   :  { %v547_v30 = vadd.f32 %v546_v28, %v534_v29 }
  0xcd   :  { %v560_v32 = vadd.f32 %v559_v24, %v547_v30 }
  0xcf   :  { %v563_v33 = vmax.f32 %v560_v32, 0.0 }
  0xd0   :  { %v535_v34 = vpop.f32.mrf.mxu0 }
  0xd1   :  { %v548_v35 = vpop.f32.mrf.mxu1  ;;  %v564_v36 = vpack.c.bf16 %v563_v33, %v563_v33 }
  0xd3   :  { %641 = vmatmul.bf16.vlgmr.msrb.gmra.mxu3 %v564_v36 }
 0x156   :  { %v642_v40 = vpop.f32.mrf.mxu3 }
 0x157   :  { %v643_v41 = vadd.f32 %v1081_v39, %v642_v40 }
 0x159   :  { %v646_v42 = vmax.f32 %v643_v41, 0.0 }
 0x15b   :  { %v647_v43 = vpack.c.bf16 %v646_v42, %v646_v42 }
 0x15d   :  { %724 = vmatmul.bf16.vlgmr.msra.gmra.mxu2 %v647_v43 }
 0x15e   :  { %v644_v44 = vpop.f32.mrf.mxu3 }
 0x1e0   :  { %v725_v46 = vpop.f32.mrf.mxu2 }
 0x1e1   :  { %v726_v47 = vadd.f32 %v1082_v45, %v725_v46 }
 0x1e3   :  { %730 = vst.msk [vmem:[#allocation7] sm:$0xff] %vm729_vm1, %v726_v47 }
 0x1e4   :  { %741 = dma.vmem_to_hbm [thread:$0]  %s737_s23, 128, %s739_s5, [#allocation4]  }
 0x1e8   :  { %v727_v48 = vpop.f32.mrf.mxu2 }
 0x1e9   :  { %1159 = dma.done.wait [#allocation4], 128  }
 0x1ea   :  { %1160 = vsyncadd [#allocation4], 4294967168 }
 0x1eb   :  { %746 = vsyncpa [#allocation3], 1 }
 0x1ec   :  { %747 = vsyncpa [#allocation6], 1 }
 0x1ed   :  { %748 = vsyncpa [#allocation4], 1 }

</bundles_post_ra>
